<compile_context>
chip_gen: v7x
topology: tpu7x:2x2x1
jax: 0.10.0
libtpu: 0.0.40
codegen_flags: <defaults>
</compile_context>

<pallas_src>
import math

import jax
import jax.numpy as jnp
from jax.experimental import pallas as pl
from jax.experimental.pallas import tpu as pltpu


def _circular_conv1d_k3_kernel(x_ref, w_ref, o_ref):
    """x_ref: (1, L, C) stored dtype; w_ref: (3, C, tD) MXU dtype (taps [prev, center, next]);
    o_ref: (1, L, tD)."""
    x = x_ref[0]                                   # (L, C) in the stored dtype (no pre-cast)
    L = x.shape[0]
    mdt = w_ref.dtype
    # Circular neighbours via sublane rolls (XLU; data movement only, any dtype).
    x_prev = pltpu.roll(x, shift=1, axis=0)        # x_prev[l] = x[(l-1) % L]
    x_next = pltpu.roll(x, shift=L - 1, axis=0)    # x_next[l] = x[(l+1) % L]
    # Three accumulating MXU dots (same total MXU work as one K=3C dot, but no
    # lane concat / (L, 3C) intermediate).  f32 accumulation throughout.
    acc = jnp.dot(x_prev.astype(mdt), w_ref[0], preferred_element_type=jnp.float32)
    acc = acc + jnp.dot(x.astype(mdt), w_ref[1], preferred_element_type=jnp.float32)
    acc = acc + jnp.dot(x_next.astype(mdt), w_ref[2], preferred_element_type=jnp.float32)
    o_ref[0] = acc.astype(o_ref.dtype)


def selective_token_embedding(x, weight, selected_mask, *, mxu_dtype=jnp.bfloat16):
    """Forward pass of SelectiveTokenEmbedding (circular Conv1d, k=3, pad=1, no bias).

    Args:
      x: (bs, t1, t2, c_in) activations.
      weight: (d_model, c_sel, 3) Conv1d weight (out_ch, in_ch, k), where
        c_sel == number of 1s in selected_mask.
      selected_mask: length-c_in sequence of 0/1 flags (PyTorch `selected_channels`).
      mxu_dtype: dtype of the MXU operands (bf16 by default: native/fast on
        v5e/v6e/v7x).  Accumulation and the output stay float32-accurate.
    Returns:
      (bs, t1, t2, d_model) array with x's dtype (matches the PyTorch module's
      post-permute output layout).
    """
    x = jnp.asarray(x)
    weight = jnp.asarray(weight)
    bs, t1, t2, c_in = x.shape
    d_model, c_sel, ktaps = weight.shape
    if ktaps != 3:
        raise ValueError(f"expected kernel_size=3 conv weight, got shape {weight.shape}")
    if len(selected_mask) != c_in:
        raise ValueError(f"selected_mask length {len(selected_mask)} != c_in {c_in}")
    sel_idx = [i for i, v in enumerate(selected_mask) if v == 1]
    if len(sel_idx) != c_sel:
        raise ValueError(
            f"weight expects {c_sel} selected channels, mask selects {len(sel_idx)}")

    L = t1 * t2
    out_dtype = x.dtype
    x_bytes = jnp.dtype(x.dtype).itemsize
    out_bytes = jnp.dtype(out_dtype).itemsize
    mxu_bytes = jnp.dtype(mxu_dtype).itemsize

    # --- Fold channel selection into the weights (no activation gather). -------
    # Per-tap (c_sel, d_model) matrices scattered into (c_in, d_model) with zero
    # rows for unselected channels; tap order [prev, center, next].
    w_taps = jnp.transpose(weight, (2, 1, 0))                      # (3, c_sel, d_model)
    w_full = jnp.zeros((3, c_in, d_model), dtype=weight.dtype)
    w_full = w_full.at[:, jnp.asarray(sel_idx, dtype=jnp.int32), :].set(w_taps)

    # --- Lane-dense output: pad d_model up to a multiple of 128. ---------------
    d_pad = ((d_model + 127) // 128) * 128
    if d_pad != d_model:
        w_full = jnp.pad(w_full, ((0, 0), (0, 0), (0, d_pad - d_model)))
    w_full = w_full.astype(mxu_dtype)              # bf16 MXU operands by default

    # --- VMEM-aware d_model tile choice (prefer nD == 1). ----------------------
    try:
        vmem_cap = int(pltpu.get_tpu_info().vmem_capacity_bytes)
    except Exception:
        vmem_cap = 64 << 20                        # conservative: v7x per-TC VMEM
    budget = int(0.6 * vmem_cap)                   # headroom for compiler scratch

    def _vmem_need(tile_d):
        x_blk = L * c_in * x_bytes
        w_blk = 3 * c_in * tile_d * mxu_bytes
        o_blk = L * tile_d * out_bytes
        inter = 2 * L * c_in * x_bytes             # two rolled copies of the x tile
        inter += 3 * L * c_in * mxu_bytes          # MXU-operand casts
        inter += L * tile_d * 4                    # f32 accumulator
        return 2 * (x_blk + w_blk + o_blk) + inter  # 2x = pipeline double-buffering

    tD = 128
    for nd in range(1, d_pad // 128 + 1):
        if d_pad % nd:
            continue
        cand = d_pad // nd
        if cand % 128:
            continue
        if _vmem_need(cand) <= budget:
            tD = cand
            break
    nD = d_pad // tD

    # Contiguous reshape only: no extra HBM pass, no wrapper-side dtype cast.
    x_flat = x.reshape(bs, L, c_in)

    vmem_limit = min(int(0.85 * vmem_cap), 110 << 20)

    out = pl.pallas_call(
        _circular_conv1d_k3_kernel,
        out_shape=jax.ShapeDtypeStruct((bs, L, d_pad), out_dtype),
        grid_spec=pltpu.PrefetchScalarGridSpec(
            num_scalar_prefetch=0,
            grid=(bs, nD),
            in_specs=[
                # x block index is constant along the nD axis -> DMA'd once per b.
                pl.BlockSpec((1, L, c_in), lambda b, j: (b, 0, 0)),
                # Weight tap stack; constant (single DMA) whenever nD == 1.
                pl.BlockSpec((3, c_in, tD), lambda b, j: (0, 0, j)),
            ],
            out_specs=pl.BlockSpec((1, L, tD), lambda b, j: (b, 0, j)),
        ),
        compiler_params=pltpu.CompilerParams(
            dimension_semantics=("parallel", "parallel"),
            vmem_limit_bytes=vmem_limit),
    )(x_flat, w_full)

    if d_pad != d_model:
        # TODO(synk): fold this slice into the consumer (it is one extra HBM
        # pass over the output) when d_model is not a multiple of 128.
        out = out[..., :d_model]
    # (bs, L, d_model) -> (bs, t1, t2, d_model)  == PyTorch's final permute(0,2,3,1)
    return out.reshape(bs, t1, t2, d_model)


if __name__ == "__main__":
    key = jax.random.PRNGKey(0)
    bs, t1, t2, c_in, d_model = 2, 4, 8, 4, 32
    selected_mask = [1, 1, 0, 1]                    # keep channels 0, 1, 3
    c_sel = sum(selected_mask)

    kx, kw = jax.random.split(key)
    x = jax.random.normal(kx, (bs, t1, t2, c_in), dtype=jnp.float32)

    # Deterministic kaiming_normal_(mode='fan_in', nonlinearity='leaky_relu')
    # for a Conv1d weight of shape (d_model, c_sel, 3): fan_in = c_sel * 3.
    fan_in = c_sel * 3
    gain = math.sqrt(2.0 / (1.0 + 0.01 ** 2))
    std = gain / math.sqrt(fan_in)
    weight = std * jax.random.normal(kw, (d_model, c_sel, 3), dtype=jnp.float32)

    # Pure-JAX reference (same math as PyTorch circular Conv1d, k=3, pad=1, no bias).
    sel_idx = [i for i, v in enumerate(selected_mask) if v == 1]
    xs = x[..., sel_idx].reshape(bs, t1 * t2, c_sel)
    ref = (jnp.roll(xs, 1, axis=1) @ weight[:, :, 0].T
           + xs @ weight[:, :, 1].T
           + jnp.roll(xs, -1, axis=1) @ weight[:, :, 2].T)
    ref = ref.reshape(bs, t1, t2, d_model)

    # Exact f32-MXU path: checks tap order / roll directions / selection folding.
    out_f32 = jax.block_until_ready(
        selective_token_embedding(x, weight, selected_mask, mxu_dtype=jnp.float32))
    assert out_f32.shape == (bs, t1, t2, d_model)
    assert jnp.allclose(out_f32, ref, atol=1e-2, rtol=1e-2), \
        float(jnp.max(jnp.abs(out_f32 - ref)))

    # Default path: bf16 MXU operands, f32 accumulation (v5e/v6e/v7x native).
    out_bf16 = jax.block_until_ready(
        selective_token_embedding(x, weight, selected_mask))
    assert out_bf16.shape == (bs, t1, t2, d_model)
    assert jnp.allclose(out_bf16, ref, atol=0.1, rtol=0.1), \
        float(jnp.max(jnp.abs(out_bf16 - ref)))

    print("KERNEL_OK")
</pallas_src>

<mosaic_0001>
module attributes {stable_mosaic.version = 11 : i64} {
  func.func @_circular_conv1d_k3_kernel(%arg0: i32, %arg1: i32, %arg2: memref<1x32x4xf32, #tpu.memory_space<vmem>>, %arg3: memref<3x4x128xf32, #tpu.memory_space<vmem>>, %arg4: memref<1x32x128xf32, #tpu.memory_space<vmem>>) attributes {dimension_semantics = [#tpu.dimension_semantics<parallel>, #tpu.dimension_semantics<parallel>], iteration_bounds = array<i64: 2, 1>, scalar_prefetch = 0 : i64, scratch_operands = 0 : i64, tpu.core_type = #tpu.core_type<tc>, window_params = [{transform_indices = @transform_0, window_bounds = array<i64: 1, 32, 4>}, {transform_indices = @transform_1, window_bounds = array<i64: 3, 4, 128>}, {transform_indices = @transform_2, window_bounds = array<i64: 1, 32, 128>}]} {
    %c0 = arith.constant 0 : index
    %c0_0 = arith.constant 0 : index
    %c0_1 = arith.constant 0 : index
    %0 = vector.load %arg2[%c0, %c0_0, %c0_1] : memref<1x32x4xf32, #tpu.memory_space<vmem>>, vector<1x32x4xf32>
    %1 = vector.shape_cast %0 : vector<1x32x4xf32> to vector<32x4xf32>
    %c1_i32 = arith.constant 1 : i32
    %2 = tpu.dynamic_rotate %1 by %c1_i32 dim 0 : vector<32x4xf32>, i32 -> vector<32x4xf32>
    %c31_i32 = arith.constant 31 : i32
    %3 = tpu.dynamic_rotate %1 by %c31_i32 dim 0 : vector<32x4xf32>, i32 -> vector<32x4xf32>
    %c0_2 = arith.constant 0 : index
    %c0_3 = arith.constant 0 : index
    %c0_4 = arith.constant 0 : index
    %4 = vector.load %arg3[%c0_2, %c0_3, %c0_4] : memref<3x4x128xf32, #tpu.memory_space<vmem>>, vector<1x4x128xf32>
    %5 = vector.shape_cast %4 : vector<1x4x128xf32> to vector<4x128xf32>
    %cst = arith.constant dense<0.000000e+00> : vector<32x128xf32>
    %6 = tpu.matmul %2, %5, %cst {dimension_numbers = #tpu.dot_dimension_numbers<[1], [0], [0], [1], [0, 0, 1, 1], [], []>} : vector<32x4xf32>, vector<4x128xf32>, vector<32x128xf32> -> vector<32x128xf32>
    %c1 = arith.constant 1 : index
    %c0_5 = arith.constant 0 : index
    %c0_6 = arith.constant 0 : index
    %7 = vector.load %arg3[%c1, %c0_5, %c0_6] : memref<3x4x128xf32, #tpu.memory_space<vmem>>, vector<1x4x128xf32>
    %8 = vector.shape_cast %7 : vector<1x4x128xf32> to vector<4x128xf32>
    %cst_7 = arith.constant dense<0.000000e+00> : vector<32x128xf32>
    %9 = tpu.matmul %1, %8, %cst_7 {dimension_numbers = #tpu.dot_dimension_numbers<[1], [0], [0], [1], [0, 0, 1, 1], [], []>} : vector<32x4xf32>, vector<4x128xf32>, vector<32x128xf32> -> vector<32x128xf32>
    %10 = arith.addf %6, %9 : vector<32x128xf32>
    %c2 = arith.constant 2 : index
    %c0_8 = arith.constant 0 : index
    %c0_9 = arith.constant 0 : index
    %11 = vector.load %arg3[%c2, %c0_8, %c0_9] : memref<3x4x128xf32, #tpu.memory_space<vmem>>, vector<1x4x128xf32>
    %12 = vector.shape_cast %11 : vector<1x4x128xf32> to vector<4x128xf32>
    %cst_10 = arith.constant dense<0.000000e+00> : vector<32x128xf32>
    %13 = tpu.matmul %3, %12, %cst_10 {dimension_numbers = #tpu.dot_dimension_numbers<[1], [0], [0], [1], [0, 0, 1, 1], [], []>} : vector<32x4xf32>, vector<4x128xf32>, vector<32x128xf32> -> vector<32x128xf32>
    %14 = arith.addf %10, %13 : vector<32x128xf32>
    %c0_11 = arith.constant 0 : index
    %c0_12 = arith.constant 0 : index
    %c0_13 = arith.constant 0 : index
    %15 = vector.load %arg4[%c0_11, %c0_12, %c0_13] : memref<1x32x128xf32, #tpu.memory_space<vmem>>, vector<1x32x128xf32>
    %16 = vector.shape_cast %15 : vector<1x32x128xf32> to vector<32x128xf32>
    %17 = vector.shape_cast %14 : vector<32x128xf32> to vector<1x32x128xf32>
    tpu.vector_store %arg4[%c0_11, %c0_12, %c0_13], %17 {strides = array<i32>} : memref<1x32x128xf32, #tpu.memory_space<vmem>>, vector<1x32x128xf32>,
    return
  }
  func.func @transform_0(%arg0: i32, %arg1: i32) -> (i32, i32, i32) {
    %c0_i32 = arith.constant 0 : i32
    %c0_i32_0 = arith.constant 0 : i32
    %c0_i32_1 = arith.constant 0 : i32
    return %arg0, %c0_i32, %c0_i32_0 : i32, i32, i32
  }
  func.func @transform_1(%arg0: i32, %arg1: i32) -> (i32, i32, i32) {
    %c0_i32 = arith.constant 0 : i32
    %c0_i32_0 = arith.constant 0 : i32
    %c0_i32_1 = arith.constant 0 : i32
    return %c0_i32, %c0_i32_0, %arg1 : i32, i32, i32
  }
  func.func @transform_2(%arg0: i32, %arg1: i32) -> (i32, i32, i32) {
    %c0_i32 = arith.constant 0 : i32
    %c0_i32_0 = arith.constant 0 : i32
    return %arg0, %c0_i32, %arg1 : i32, i32, i32
  }
}

</mosaic_0001>

<bundles_post_ra>
// kernel: tpu_custom_call.1
= control target key start
LH: loop header
LB: loop body
LE: loop exit
PB: predicated region body
PF: predicated region fallthrough
CT: control target
= control target key end

     0   :  { %7 = vsyncpa [#allocation3], 0  ;;  %s1003_s0 = inlined_call_operand.vmem [shape: f32[2,32,4], index: 0, kind: input, shape index: {}]   ;;  %s1004_s1 = inlined_call_operand.vmem [shape: f32[3,4,128], index: 1, kind: input, shape index: {}]   ;;  %s1005_s2 = inlined_call_operand.hbm [shape: f32[2,32,128], index: 2, kind: output, shape index: {}]  }
   0x1   :  { %9 = vsyncpa [#allocation3 + $0x1], 0  ;;  %s851_s9 = smov 0   ;;  %s853_s10 = smov 0  }
   0x2   :  { %s855_s11 = smov 0   ;;  %s857_s12 = smov 0  }
   0x3   :  { %s859_s13 = smov 0   ;;  %s861_s14 = smov 0  }
   0x4 LB: > { %s614_s15 = sadd.s32 4294967295, %s831_s14   ;;  %s615_s16 = sadd.s32 4294967294, %s831_s14   ;;  %s831_s14 = sphi %s861_s14, %s15_s14   ;;  %s827_s13 = sphi %s859_s13, %s1012_s13   ;;  %s823_s12 = sphi %s857_s12, %s1011_s12   ;;  %s819_s11 = sphi %s855_s11, %s1010_s11   ;;  %s815_s10 = sphi %s853_s10, %s1009_s10   ;;  %s811_s9 = sphi %s851_s9, %s1008_s9  }
   0x5   : > { %s27_s17 = sadd.s32 1, %s827_s13  ;;  %s88_s18 = sadd.s32 1, %s819_s11 }
   0x6   : > { %p29_p0 = scmp.ge.s32.totalorder %s27_s17, 2  ;;  %p98_p1 = scmp.ne.s32.totalorder %s819_s11, %s815_s10 }
   0x7   : > { %p99_p2 = scmp.eq.s32.totalorder %s614_s15, 1  ;;  %p104_p3 = scmp.ne.s32.totalorder %s815_s10, %s811_s9 }
   0x8   : > { %s1014_s17 = smov (%p29_p0, %s27_s17), 0  ;;  %p105_p5 = scmp.eq.s32.totalorder %s615_s16, 1 }
   0x9   : > { %p891_p4 = por %p99_p2, %p98_p1  ;;  %s83_s20 = ssub.s32 %s827_s13, %s1014_s17 }
   0xa   : > { %p619_p6 = scmp.ge.s32.totalorder %s831_s14, 1  ;;  %p86_p7 = scmp.eq.s32.totalorder %s83_s20, 0 }
   0xb   : > { %p898_p8 = por %p105_p5, %p104_p3  ;;  %p138_p9 = scmp.lt.s32.totalorder %s831_s14, 3 }
   0xc   : > { %s904_s22 = scalar_select %p86_p7, %s819_s11, %s88_s18  }
   0xd   : > { %p139_p10 = pnand %p619_p6, %p138_p9 }
   0xe   : > { %v623_v0 = vld [vmem:[%s1004_s1 + $0x4] sm:$0xf] (!%p139_p10)  ;;  %vm213_vm0 = vcmask (!%p139_p10), 1043456   ;;  %p164_p11 = scmp.lt.s32.totalorder (!%p139_p10), %s823_s12, 1  ;;  %v181_v1 = vlaneseq (!%p139_p10)  ;;  %v197_v2 = vld [vmem:[%s1004_s1] sm:$0xf] (!%p139_p10) }
   0xf   : > { %142 = sbr.rel (%p139_p10) target bundleno = 274 (0x112), region = 28  ;;  %662 = vmatprep.subr.msk.mxu1 (!%p139_p10), %vm213_vm0, %v623_v0  ;;  %v634_v3 = vld [vmem:[%s1004_s1 + $0x8] sm:$0xf] (!%p139_p10)  ;;  %670 = vmatprep.subr.msk.mxu0 (!%p139_p10), %vm213_vm0, %v197_v2  ;;  %vm200_vm1 = vcmask (!%p139_p10), 31744   ;;  %s161_s6 = sand.u32 (!%p139_p10), 1, %s815_s10  }
  0x10   : > { %663 = vmatpush3.msk.msra.mxu1 (!%p139_p10), %vm213_vm0, %v623_v0  ;;  %v182_v4 = vshrl.u32 (!%p139_p10), %v181_v1, 7  ;;  %671 = vmatpush3.msk.msra.mxu0 (!%p139_p10), %vm213_vm0, %v197_v2  ;;  %s620_s7 = sshll.u32 (!%p139_p10), %s161_s6, 5  ;;  %s646_s16 = sshll.u32 (!%p139_p10), %s823_s12, 9 }
  0x11   : > { %686 = vmatprep.subr.msk.mxu1 (!%p139_p10), %vm213_vm0, %v197_v2  ;;  %678 = vmatprep.subr.msk.mxu0 (!%p139_p10), %vm213_vm0, %v634_v3  ;;  %s163_s8 = scalar_lea.vmem (!%p139_p10), [#allocation2], %s620_s7  ;;  %s955_s23 = scalar_lea.hbm (!%p139_p10), %s1005_s2, %s646_s16 }
  0x12   : > { %vm183_vm2 = vcmp.lt.s32.totalorder (!%p139_p10), %v182_v4, 1  ;;  %vm192_vm3 = vcmp.lt.s32.totalorder (!%p139_p10), %v182_v4, 7  ;;  %s527_s15 = sshll.u32 (!%p139_p10), %s163_s8, 4  ;;  %s957_s24 = scalar_lea.sflag (!%p139_p10), [#allocation3], %s161_s6  ;;  %s950_s15 = int_to_ptr.vmem [resolvable:$true] %s527_s15 }
  0x13   : > { %s833_s25 = smov (!%p139_p10), [#allocation2]  }
  0x14   : > { %s757_s26 = sshll.u32 (!%p139_p10), %s833_s25, 4  ;;  %s758_s26 = int_to_ptr.vmem [resolvable:$false] %s757_s26 }
  0x15   : > { %s759_s27 = scalar_lea.vmem (!%p139_p10), %s758_s26, 1024  ;;  %p760_p1 = scmp.lt.s32.totalorder (!%p139_p10), %s950_s15, %s758_s26 }
  0x16   : > { %s165_s29 = scalar_select %p164_p11, %s823_s12, 1 }
  0x17   : > { %s753_s12 = scalar_lea.vmem %s950_s15, 512 }
  0x18   : > { %s645_s30 = sshll.u32 %s165_s29, 5  ;;  %p754_p12 = scmp.ne.s32.totalorder %s950_s15, %s753_s12 }
  0x19   : > { %s168_s5 = scalar_lea.vmem %s1003_s0, %s645_s30  ;;  %p761_p2 = scmp.lt.s32.totalorder %s759_s27, %s753_s12 }
  0x1a   : > { %v173_v5 = vld [vmem:[%s168_s5] sm:$0xff]  ;;  %v174_v6 = vld [vmem:[%s168_s5 + $0x8] sm:$0xff]  ;;  %v176_v7 = vld [vmem:[%s168_s5 + $0x18] sm:$0xff]  ;;  %p755_p13 = pnand %p754_p12, %p891_p4 }
  0x1b   : > { %v177_v8 = vrot.slane %v173_v5, 7  ;;  %v188_v9 = vrot.slane %v173_v5, 1  ;;  %664 = vmatprep.mubr.msk.f32.mxu1 %vm200_vm1, %v173_v5  ;;  %v178_v10 = vrot.slane %v174_v6, 7  ;;  %v189_v11 = vrot.slane %v174_v6, 1  ;;  %v175_v12 = vld [vmem:[%s168_s5 + $0x10] sm:$0xff]  ;;  %p762_p3 = por %p761_p2, %p760_p1 }
  0x1c   : > { %665 = vmatmul.mubr.msk.f32.vlgmr.msra.gmra.mrb[0].mxu1 %vm200_vm1, %v174_v6  ;;  %v180_v13 = vrot.slane %v176_v7, 7  ;;  %v179_v14 = vrot.slane %v175_v12, 7  ;;  %v190_v19 = vrot.slane %v175_v12, 1  ;;  %v191_v20 = vrot.slane %v176_v7, 1  ;;  %p756_p0 = pneg %p755_p13 }
  0x1d   : > { %667 = vmatprep.mubr.msk.f32.mxu1 %vm200_vm1, %v175_v12  ;;  %687 = vmatpush3.msk.msra.mxu1 %vm213_vm0, %v197_v2  ;;  %v186_v15 = vsel %vm183_vm2, %v177_v8, %v178_v10  ;;  %v195_v17 = vsel %vm192_vm3, %v188_v9, %v189_v11 }
  0x1e   : > { %v187_v16 = vsel %vm183_vm2, %v180_v13, %v177_v8  ;;  %v185_v18 = vsel %vm183_vm2, %v178_v10, %v179_v14  ;;  %v194_v21 = vsel %vm192_vm3, %v189_v11, %v190_v19  ;;  %v184_v22 = vsel %vm183_vm2, %v179_v14, %v180_v13  ;;  %p763_p5 = pnand %p762_p3, %p756_p0 }
  0x1f   : > { %672 = vmatprep.mubr.msk.f32.mxu0 %vm200_vm1, %v187_v16  ;;  %v193_v23 = vsel %vm192_vm3, %v190_v19, %v191_v20  ;;  %v196_v24 = vsel %vm192_vm3, %v191_v20, %v188_v9 }
  0x20   : > { %673 = vmatmul.mubr.msk.f32.vlgmr.msra.gmra.mrb[0].mxu0 %vm200_vm1, %v186_v15  ;;  %668 = vmatmul.mubr.msk.f32.gmra.mrb[2].mxu1 %vm200_vm1, %v176_v7 }
  0x21   : > { %679 = vmatpush3.msk.msra.mxu0 %vm213_vm0, %v634_v3  ;;  %680 = vmatprep.mubr.msk.f32.mxu0 %vm200_vm1, %v195_v17 }
  0x22   : > { %675 = vmatprep.mubr.msk.f32.mxu1 %vm200_vm1, %v185_v18 }
  0x28   : > { %681 = vmatmul.mubr.msk.f32.vlgmr.msra.gmra.mrb[0].mxu0 %vm200_vm1, %v194_v21  ;;  %676 = vmatmul.mubr.msk.f32.vlgmr.msra.gmra.mrb[2].mxu1 %vm200_vm1, %v184_v22 }
  0x29   : > { %683 = vmatprep.mubr.msk.f32.mxu0 %vm200_vm1, %v193_v23 }
  0x2c   : > { %684 = vmatmul.mubr.msk.f32.gmra.mrb[2].mxu0 %vm200_vm1, %v196_v24 }
  0xef   : > { %v666_v25 = vpop.f32.mrb[0].mxu1 }
  0xf0   : > { %v283_v26 = vpop.f32.mrb[1].mxu1 }
  0xfb   : > { %v682_v27 = vpop.f32.mrb[0].mxu0  ;;  %v677_v28 = vpop.f32.mrb[2].mxu1 }
  0xfc   : > { %v688_v29 = vadd.f32 %v682_v27, %v666_v25  ;;  %v485_v30 = vpop.f32.mrb[1].mxu0  ;;  %v393_v31 = vpop.f32.mrb[3].mxu1 }
  0xfd   : > { %v689_v32 = vadd.f32 %v485_v30, %v283_v26 }
  0xfe   : > { %509 = vst [vmem:[%s163_s8 + $0x8] sm:$0xff] %v688_v29 }
  0xff   : > { %508 = vst [vmem:[%s163_s8] sm:$0xff] %v689_v32  ;;  %v685_v33 = vpop.f32.mrb[2].mxu0 }
 0x100   : > { %v690_v34 = vadd.f32 %v685_v33, %v677_v28  ;;  %v495_v35 = vpop.f32.mrb[3].mxu0 }
 0x101   : > { %v691_v36 = vadd.f32 %v495_v35, %v393_v31 }
 0x102   : > { %511 = vst [vmem:[%s163_s8 + $0x18] sm:$0xff] %v690_v34 }
 0x103   : > { %510 = vst [vmem:[%s163_s8 + $0x10] sm:$0xff] %v691_v36 }
 0x104   : > { %766 = shalt.err (!%p763_p5)
}
 0x105   : > { %s767_s28 = scalar_lea.hbm %s955_s23, 512  ;;  %s771_s3 = scalar_lea.hbm %s1005_s2, 1024 }
 0x106   : > { %p768_p6 = scmp.ne.s32.totalorder %s955_s23, %s767_s28  ;;  %p772_p10 = scmp.lt.u32.totalorder %s955_s23, %s1005_s2 }
 0x107   : > { %p773_p11 = scmp.lt.u32.totalorder %s771_s3, %s767_s28  ;;  %p775_p13 = scmp.lt.u32.totalorder %s767_s28, %s955_s23 }
 0x108   : > { %p769_p7 = pnand %p768_p6, %p891_p4 }
 0x109   : > { %p774_p12 = por %p773_p11, %p772_p10 }
 0x10a   : > { %p770_p9 = pneg %p769_p7 }
 0x10b   : > { %p776_p0 = por %p775_p13, %p774_p12 }
 0x10d   : > { %p777_p1 = pnand %p776_p0, %p770_p9 }
 0x10f   : > { %780 = shalt.err (!%p777_p1)
}
 0x110   : > { %s834_s6 = smov 128   ;;  %s835_s7 = smov 8  }
 0x111   : > { %696 = dma.vmem_to_hbm [thread:$0]  (%p891_p4), %s950_s15, 512, %s955_s23, %s957_s24, %s834_s6, %s834_s6, %s835_s7  }
 0x112 PF: > { %p702_p2 = scmp.ge.s32.totalorder %s831_s14, 2  ;;  %s542_s8 = sand.u32 1, %s811_s9  }
 0x113   : > { %s543_s16 = scalar_lea.sflag [#allocation3], %s542_s8 }
 0x114   : > { %p699_p3 = pnand %p702_p2, %p898_p8 }
 0x116   : > { %806 = dma.done.wait (!%p699_p3), %s543_s16, 512  }
 0x117   : > { %808 = vsyncadd (!%p699_p3), %s543_s16, 4294966784  ;;  %s15_s14 = sadd.s32 1, %s831_s14   ;;  %s1008_s9 = smov %s815_s10 }
 0x118   : > { %p12_p5 = scmp.ge.s32.totalorder %s15_s14, 4   ;;  %s1009_s10 = smov %s819_s11 }
 0x119   : > { %s1010_s11 = smov %s904_s22  ;;  %s1011_s12 = smov %s827_s13 }
 0x11a   : > { %s1012_s13 = smov %s1014_s17  ;;  %14 = sbr.rel (!%p12_p5) target bundleno = 4 (0x4), region = 68 }
 0x121   :  { %548 = vsyncpa [#allocation3], 1 }
 0x122   :  { %550 = vsyncpa [#allocation3 + $0x1], 1 }

</bundles_post_ra>
